<compile_context>
chip_gen: v6e
topology: v6e:2x2x1
jax: 0.10.0
libtpu: 0.0.40
codegen_flags: <defaults>
</compile_context>

<pallas_src>
import functools

import jax
import jax.numpy as jnp
from jax import lax
from jax.experimental import pallas as pl
from jax.experimental.pallas import tpu as pltpu


# ----------------------------- hardware-aware sizing -----------------------------

@functools.lru_cache(maxsize=1)
def _vmem_capacity_bytes() -> int:
    """Physical VMEM capacity of the local TPU (trace-time query).

    Falls back to the most conservative production value (v7x: 64 MiB) if the query
    is unavailable (e.g. interpret mode / non-TPU backend).
    """
    try:
        return int(pltpu.get_tpu_info().vmem_capacity_bytes)
    except Exception:
        return 64 * 1024 * 1024


def _vmem_budgets():
    """Returns (block_buffer_budget, vmem_limit_bytes) for the local chip generation."""
    cap = _vmem_capacity_bytes()
    if cap >= 128 * 1024 * 1024:
        # v5e / v6e: plenty of headroom -> large per-step DMA payloads.
        return 48 * 1024 * 1024, 96 * 1024 * 1024
    # v7x (64 MiB physical) or unknown: leave room for Mosaic internal scratch,
    # f32 upcast intermediates and the compiler's own buffering.
    return cap // 4, (cap * 3) // 4


def _sublane_granule(dtype) -> int:
    """Row-tile granule matching the packed-dtype native sublane tiling."""
    itemsize = jnp.dtype(dtype).itemsize
    if itemsize >= 4:
        return 8       # f32: (8, 128)
    if itemsize == 2:
        return 16      # bf16: (16, 128)
    return 32          # int8 / fp8: (32, 128)


def _pick_tile_n(n: int, d: int, itemsize: int, granule: int, block_budget: int) -> int:
    """Row tile: as large as the VMEM block budget allows, but never so large that the
    grid degenerates to a single step (>= ~8 steps keeps DMA/compute overlapped and
    feeds both v7x TensorCores), rounded to the packed-dtype granule, and preferring an
    even grid length for 2-TC balance."""
    if n <= granule:
        return n                                # full-dim block: always legal
    per_row = 3 * d * itemsize * 2              # x + res + out, double-buffered
    tile = block_budget // max(per_row, 1)
    tile = min(tile, 1024)                      # diminishing returns past ~1K rows
    min_steps = 8
    tile = min(tile, max(granule, pl.cdiv(n, min_steps)))
    tile = max((tile // granule) * granule, granule)
    # Prefer an even number of grid steps (balances the two v7x TensorCores;
    # harmless on single-TC chips).
    steps = pl.cdiv(n, tile)
    while steps > 1 and steps % 2 == 1 and tile > granule:
        tile -= granule
        steps = pl.cdiv(n, tile)
    return tile


# ----------------------------- kernel bodies -----------------------------

def _layernorm(x_f32, gamma, beta, eps, epilogue_dtype):
    """Two-pass LayerNorm over the last dim: stats in f32, affine in epilogue dtype."""
    inv_d = 1.0 / x_f32.shape[-1]
    mean = jnp.sum(x_f32, axis=-1, keepdims=True) * inv_d
    xc = x_f32 - mean
    var = jnp.sum(xc * xc, axis=-1, keepdims=True) * inv_d
    normed = (xc * lax.rsqrt(var + eps)).astype(epilogue_dtype)
    return normed * gamma + beta               # gamma/beta pre-cast in the wrapper


def _make_eval_kernel(eps: float, epilogue_dtype):
    """'nda' with dropout = identity (eval mode). No PRNG, no seed argument."""

    def kernel(x_ref, res_ref, gamma_ref, beta_ref, o_ref):
        x = x_ref[...].astype(jnp.float32)
        out = _layernorm(x, gamma_ref[...], beta_ref[...], eps, epilogue_dtype)
        out = out + res_ref[...].astype(epilogue_dtype)
        o_ref[...] = out.astype(o_ref.dtype)

    return kernel


def _make_train_kernel(dropout_p: float, eps: float, epilogue_dtype, d_model: int):
    """'nda' with in-kernel inverted dropout (TPU hardware PRNG)."""
    inv_keep = 1.0 / (1.0 - dropout_p)
    use_half = (d_model % 2 == 0)               # one u32 draw covers two elements
    thr16 = min(int(round(dropout_p * 65536.0)), 65535)
    thr32 = min(int(dropout_p * (2.0 ** 32)), 2 ** 32 - 1)

    def kernel(seed_ref, x_ref, res_ref, gamma_ref, beta_ref, o_ref):
        x = x_ref[...].astype(jnp.float32)
        out = _layernorm(x, gamma_ref[...], beta_ref[...], eps, epilogue_dtype)

        # Independent mask per tile: mix the grid index into the seed.
        pltpu.prng_seed(seed_ref[0], pl.program_id(0))
        rows, cols = out.shape
        if use_half:
            bits = pltpu.bitcast(pltpu.prng_random_bits((rows, cols // 2)), jnp.uint32)
            lo = bits & jnp.uint32(0xFFFF)
            hi = bits >> 16
            keep = jnp.concatenate([lo, hi], axis=-1) >= jnp.uint32(thr16)
        else:
            bits = pltpu.bitcast(pltpu.prng_random_bits((rows, cols)), jnp.uint32)
            keep = bits >= jnp.uint32(thr32)

        out = jnp.where(keep,
                        out * jnp.asarray(inv_keep, epilogue_dtype),
                        jnp.asarray(0.0, epilogue_dtype))
        out = out + res_ref[...].astype(epilogue_dtype)
        o_ref[...] = out.astype(o_ref.dtype)

    return kernel


# ----------------------------- launch wrapper -----------------------------

@functools.partial(jax.jit, static_argnames=("dropout_p", "training", "eps"))
def pre_post_processing(tensor, input_tensor, gamma, beta, seed=None,
                        dropout_p: float = 0.1, training: bool = False,
                        eps: float = 1e-5):
    """Fused 'nda' PrePostProcessing forward.

    tensor, input_tensor: (seq_len, batch, d_model)
    gamma, beta:          (1, d_model)  LayerNorm affine params
    seed:                 (1,) int32    dropout PRNG seed (only used when training=True)
    """
    T, B, D = tensor.shape
    N = T * B
    x = tensor.reshape(N, D)
    res = input_tensor.reshape(N, D)

    # bf16 epilogue on bf16 I/O (v6e/v7x bf16 VPU); f32 otherwise.
    epilogue_dtype = jnp.bfloat16 if tensor.dtype == jnp.bfloat16 else jnp.float32
    gamma_c = gamma.reshape(1, D).astype(epilogue_dtype)
    beta_c = beta.reshape(1, D).astype(epilogue_dtype)

    itemsize = jnp.dtype(tensor.dtype).itemsize
    granule = _sublane_granule(tensor.dtype)
    block_budget, vmem_limit = _vmem_budgets()
    tile_n = _pick_tile_n(N, D, itemsize, granule, block_budget)
    grid = (pl.cdiv(N, tile_n),)

    cparams = pltpu.CompilerParams(
        dimension_semantics=("parallel",),      # rows independent; shards across v7x TCs
        vmem_limit_bytes=vmem_limit,
    )
    out_shape = jax.ShapeDtypeStruct((N, D), tensor.dtype)

    apply_dropout = training and dropout_p > 0.0

    if apply_dropout:
        kernel = _make_train_kernel(dropout_p, eps, epilogue_dtype, D)
        grid_spec = pltpu.PrefetchScalarGridSpec(
            num_scalar_prefetch=1,              # seed -> SMEM
            grid=grid,
            in_specs=[
                pl.BlockSpec((tile_n, D), lambda i, s: (i, 0)),   # x
                pl.BlockSpec((tile_n, D), lambda i, s: (i, 0)),   # residual input
                pl.BlockSpec((1, D), lambda i, s: (0, 0)),        # gamma
                pl.BlockSpec((1, D), lambda i, s: (0, 0)),        # beta
            ],
            out_specs=pl.BlockSpec((tile_n, D), lambda i, s: (i, 0)),
        )
        out = pl.pallas_call(
            kernel, out_shape=out_shape, grid_spec=grid_spec,
            compiler_params=cparams,
        )(seed, x, res, gamma_c, beta_c)
    else:
        kernel = _make_eval_kernel(eps, epilogue_dtype)
        grid_spec = pl.GridSpec(
            grid=grid,
            in_specs=[
                pl.BlockSpec((tile_n, D), lambda i: (i, 0)),      # x
                pl.BlockSpec((tile_n, D), lambda i: (i, 0)),      # residual input
                pl.BlockSpec((1, D), lambda i: (0, 0)),           # gamma
                pl.BlockSpec((1, D), lambda i: (0, 0)),           # beta
            ],
            out_specs=pl.BlockSpec((tile_n, D), lambda i: (i, 0)),
        )
        out = pl.pallas_call(
            kernel, out_shape=out_shape, grid_spec=grid_spec,
            compiler_params=cparams,
        )(x, res, gamma_c, beta_c)

    return out.reshape(T, B, D)


# ----------------------------- reference & test -----------------------------

def _reference(tensor, input_tensor, gamma, beta, eps=1e-5):
    """Pure-JAX reference for eval mode (dropout = identity)."""
    x = tensor.astype(jnp.float32)
    mean = jnp.mean(x, axis=-1, keepdims=True)
    var = jnp.mean((x - mean) ** 2, axis=-1, keepdims=True)
    normed = (x - mean) * lax.rsqrt(var + eps)
    out = normed * gamma.reshape(1, 1, -1) + beta.reshape(1, 1, -1)
    return out + input_tensor.astype(jnp.float32)


if __name__ == "__main__":
    d_model = 32
    seq_len = 8
    batch = 2
    dropout_p = 0.1

    key = jax.random.PRNGKey(0)
    k1, k2, k3, k4 = jax.random.split(key, 4)

    tensor = jax.random.normal(k1, (seq_len, batch, d_model), dtype=jnp.float32)
    input_tensor = jax.random.normal(k2, (seq_len, batch, d_model), dtype=jnp.float32)

    # LayerNorm affine params (elementwise_affine=True in the module).
    gamma = 1.0 + 0.01 * jax.random.normal(k3, (1, d_model), dtype=jnp.float32)
    beta = 0.01 * jax.random.normal(k4, (1, d_model), dtype=jnp.float32)

    seed = jnp.array([1234], dtype=jnp.int32)

    # Eval mode (dropout = identity), f32 I/O — check against pure-JAX reference.
    out_eval = pre_post_processing(tensor, input_tensor, gamma, beta, seed,
                                   dropout_p=dropout_p, training=False)
    out_eval = jax.block_until_ready(out_eval)
    ref = _reference(tensor, input_tensor, gamma, beta)
    assert out_eval.shape == (seq_len, batch, d_model)
    assert jnp.allclose(out_eval, ref, atol=1e-5, rtol=1e-5), "f32 mismatch vs reference"

    # bf16 I/O exercises the bf16-epilogue path (looser tolerance: bf16 output rounding).
    t_bf16 = tensor.astype(jnp.bfloat16)
    r_bf16 = input_tensor.astype(jnp.bfloat16)
    out_bf16 = pre_post_processing(t_bf16, r_bf16, gamma, beta, seed,
                                   dropout_p=dropout_p, training=False)
    out_bf16 = jax.block_until_ready(out_bf16)
    ref_bf16 = _reference(t_bf16.astype(jnp.float32), r_bf16.astype(jnp.float32), gamma, beta)
    assert out_bf16.shape == (seq_len, batch, d_model)
    assert jnp.allclose(out_bf16.astype(jnp.float32), ref_bf16, atol=1e-1, rtol=5e-2), \
        "bf16 mismatch vs reference"

    # Training mode exercises the in-kernel hardware PRNG, which only lowers on real TPU
    # (no CPU/interpret implementation of prng_seed) — guard so the script runs everywhere.
    if jax.devices()[0].platform == "tpu":
        out_train = pre_post_processing(tensor, input_tensor, gamma, beta, seed,
                                        dropout_p=dropout_p, training=True)
        out_train = jax.block_until_ready(out_train)
        assert out_train.shape == (seq_len, batch, d_model)
        assert bool(jnp.all(jnp.isfinite(out_train)))

    print("KERNEL_OK")
</pallas_src>

<mosaic_0001>
module attributes {stable_mosaic.version = 11 : i64} {
  func.func @kernel(%arg0: i32, %arg1: memref<8x32xf32, #tpu.memory_space<vmem>>, %arg2: memref<8x32xf32, #tpu.memory_space<vmem>>, %arg3: memref<1x32xf32, #tpu.memory_space<vmem>>, %arg4: memref<1x32xf32, #tpu.memory_space<vmem>>, %arg5: memref<8x32xf32, #tpu.memory_space<vmem>>) attributes {dimension_semantics = [#tpu.dimension_semantics<parallel>], iteration_bounds = array<i64: 2>, scalar_prefetch = 0 : i64, scratch_operands = 0 : i64, tpu.core_type = #tpu.core_type<tc>, window_params = [{transform_indices = @transform_0, window_bounds = array<i64: 8, 32>}, {transform_indices = @transform_1, window_bounds = array<i64: 8, 32>}, {pipeline_mode = #tpu.pipeline_mode<synchronous>, transform_indices = @transform_2, window_bounds = array<i64: 1, 32>}, {pipeline_mode = #tpu.pipeline_mode<synchronous>, transform_indices = @transform_3, window_bounds = array<i64: 1, 32>}, {transform_indices = @transform_4, window_bounds = array<i64: 8, 32>}]} {
    %c0 = arith.constant 0 : index
    %c0_0 = arith.constant 0 : index
    %0 = vector.load %arg1[%c0, %c0_0] : memref<8x32xf32, #tpu.memory_space<vmem>>, vector<8x32xf32>
    %c0_1 = arith.constant 0 : index
    %c0_2 = arith.constant 0 : index
    %1 = vector.load %arg3[%c0_1, %c0_2] : memref<1x32xf32, #tpu.memory_space<vmem>>, vector<1x32xf32>
    %c0_3 = arith.constant 0 : index
    %c0_4 = arith.constant 0 : index
    %2 = vector.load %arg4[%c0_3, %c0_4] : memref<1x32xf32, #tpu.memory_space<vmem>>, vector<1x32xf32>
    %cst = arith.constant dense<0.000000e+00> : vector<8xf32>
    %3 = vector.multi_reduction <add>, %0, %cst [1] : vector<8x32xf32> to vector<8xf32>
    %4 = vector.shape_cast %3 : vector<8xf32> to vector<8x1xf32>
    %cst_5 = arith.constant 3.125000e-02 : f32
    %5 = vector.broadcast %cst_5 : f32 to vector<8x1xf32>
    %6 = arith.mulf %4, %5 : vector<8x1xf32>
    %7 = vector.broadcast %6 : vector<8x1xf32> to vector<8x32xf32>
    %8 = arith.subf %0, %7 : vector<8x32xf32>
    %9 = arith.mulf %8, %8 : vector<8x32xf32>
    %cst_6 = arith.constant dense<0.000000e+00> : vector<8xf32>
    %10 = vector.multi_reduction <add>, %9, %cst_6 [1] : vector<8x32xf32> to vector<8xf32>
    %11 = vector.shape_cast %10 : vector<8xf32> to vector<8x1xf32>
    %cst_7 = arith.constant 3.125000e-02 : f32
    %12 = vector.broadcast %cst_7 : f32 to vector<8x1xf32>
    %13 = arith.mulf %11, %12 : vector<8x1xf32>
    %cst_8 = arith.constant 9.99999974E-6 : f32
    %14 = vector.broadcast %cst_8 : f32 to vector<8x1xf32>
    %15 = arith.addf %13, %14 : vector<8x1xf32>
    %16 = math.rsqrt %15 : vector<8x1xf32>
    %17 = vector.broadcast %16 : vector<8x1xf32> to vector<8x32xf32>
    %18 = arith.mulf %8, %17 : vector<8x32xf32>
    %19 = vector.broadcast %1 : vector<1x32xf32> to vector<8x32xf32>
    %20 = arith.mulf %18, %19 : vector<8x32xf32>
    %21 = vector.broadcast %2 : vector<1x32xf32> to vector<8x32xf32>
    %22 = arith.addf %20, %21 : vector<8x32xf32>
    %c0_9 = arith.constant 0 : index
    %c0_10 = arith.constant 0 : index
    %23 = vector.load %arg2[%c0_9, %c0_10] : memref<8x32xf32, #tpu.memory_space<vmem>>, vector<8x32xf32>
    %24 = arith.addf %22, %23 : vector<8x32xf32>
    %c0_11 = arith.constant 0 : index
    %c0_12 = arith.constant 0 : index
    %25 = vector.load %arg5[%c0_11, %c0_12] : memref<8x32xf32, #tpu.memory_space<vmem>>, vector<8x32xf32>
    tpu.vector_store %arg5[%c0_11, %c0_12], %24 {strides = array<i32>} : memref<8x32xf32, #tpu.memory_space<vmem>>, vector<8x32xf32>,
    return
  }
  func.func @transform_0(%arg0: i32) -> (i32, i32) {
    %c0_i32 = arith.constant 0 : i32
    %c0_i32_0 = arith.constant 0 : i32
    return %arg0, %c0_i32 : i32, i32
  }
  func.func @transform_1(%arg0: i32) -> (i32, i32) {
    %c0_i32 = arith.constant 0 : i32
    %c0_i32_0 = arith.constant 0 : i32
    return %arg0, %c0_i32 : i32, i32
  }
  func.func @transform_2(%arg0: i32) -> (i32, i32) {
    %c0_i32 = arith.constant 0 : i32
    %c0_i32_0 = arith.constant 0 : i32
    %c0_i32_1 = arith.constant 0 : i32
    return %c0_i32, %c0_i32_0 : i32, i32
  }
  func.func @transform_3(%arg0: i32) -> (i32, i32) {
    %c0_i32 = arith.constant 0 : i32
    %c0_i32_0 = arith.constant 0 : i32
    %c0_i32_1 = arith.constant 0 : i32
    return %c0_i32, %c0_i32_0 : i32, i32
  }
  func.func @transform_4(%arg0: i32) -> (i32, i32) {
    %c0_i32 = arith.constant 0 : i32
    %c0_i32_0 = arith.constant 0 : i32
    return %arg0, %c0_i32 : i32, i32
  }
}

</mosaic_0001>

<bundles_post_ra>
// kernel: pre_post_processing.1
= control target key start
LH: loop header
LB: loop body
LE: loop exit
PB: predicated region body
PF: predicated region fallthrough
CT: control target
= control target key end

     0   :  { %9 = vsyncpa [#allocation3], 0  ;;  %s823_s0 = inlined_call_operand.hbm [shape: f32[16,32], index: 0, kind: input, shape index: {}]   ;;  %s824_s1 = inlined_call_operand.hbm [shape: f32[16,32], index: 1, kind: input, shape index: {}]   ;;  %s825_s2 = inlined_call_operand.vmem [shape: f32[1,32], index: 2, kind: input, shape index: {}]   ;;  %s826_s3 = inlined_call_operand.vmem [shape: f32[1,32], index: 3, kind: input, shape index: {}]   ;;  %s827_s4 = inlined_call_operand.hbm [shape: f32[16,32], index: 4, kind: output, shape index: {}]  }
   0x1   :  { %11 = vsyncpa [#allocation3 + $0x1], 0 }
   0x2   :  { %12 = vsyncpa [#allocation6], 0 }
   0x3   :  { %14 = vsyncpa [#allocation6 + $0x1], 0 }
   0x4   :  { %15 = vsyncpa [#allocation4], 0 }
   0x5   :  { %17 = vsyncpa [#allocation4 + $0x1], 0  ;;  %s615_s15 = smov 0   ;;  %s617_s16 = smov 0  }
   0x6   :  { %s619_s17 = smov 0   ;;  %s621_s18 = smov 0  }
   0x7 LB: > { %s636_s19 = sadd.s32 4294967295, %s585_s18   ;;  %s391_s20 = sadd.s32 4294967294, %s585_s18   ;;  %s585_s18 = sphi %s621_s18, %s846_s18   ;;  %s581_s17 = sphi %s619_s17, %s845_s17   ;;  %s577_s16 = sphi %s617_s16, %s844_s16   ;;  %s573_s15 = sphi %s615_s15, %s843_s15  }
   0x8   : > { %s640_s21 = sadd.s32 1, %s585_s18   ;;  %s30_s22 = sadd.s32 1, %s581_s17 }
   0x9   : > { %s27_s23 = ssub.s32 %s585_s18, %s640_s21  ;;  %p37_p0 = scmp.ne.s32.totalorder %s581_s17, %s577_s16 }
   0xa   : > { %p28_p1 = scmp.eq.s32.totalorder %s27_s23, 0  ;;  %p38_p2 = scmp.eq.s32.totalorder %s585_s18, 0 }
   0xb   : > { %p43_p3 = scmp.ne.s32.totalorder %s577_s16, %s573_s15  ;;  %p44_p4 = scmp.eq.s32.totalorder %s636_s19, 0 }
   0xc   : > { %s652_s24 = scalar_select %p28_p1, %s581_s17, %s30_s22  }
   0xd   : > { %p654_p5 = por %p38_p2, %p37_p0  ;;  %p658_p6 = por %p44_p4, %p43_p3 }
   0xe   : > { %p135_p7 = scmp.eq.s32.totalorder %s636_s19, 1  ;;  %p141_p8 = scmp.eq.s32.totalorder %s391_s20, 1 }
   0xf   : > { %s831_s26 = scalar_select %p658_p6, 1, 0 }
  0x10   : > { %p425_p10 = scmp.lt.s32.totalorder %s585_s18, 2  ;;  %p665_p11 = por %p135_p7, %p37_p0 }
  0x11   : > { %p669_p12 = por %p141_p8, %p43_p3  ;;  %s674_s29 = sand.u32 1, %s581_s17  }
  0x12   : > { %s832_s27 = scalar_select %p665_p11, 1, 0 }
  0x13   : > { %s833_s28 = scalar_select %p669_p12, 1, 0 }
  0x14   : > { %s395_s30 = sshll.u32 %s585_s18, 7  ;;  %s394_s5 = sshll.u32 %s674_s29, 3 }
  0x15   : > { %s683_s8 = scalar_lea.hbm %s823_s0, %s395_s30  ;;  %s171_s9 = scalar_lea.vmem [#allocation2], %s394_s5 }
  0x16   : > { %s178_s10 = sshll.u32 %s171_s9, 4  ;;  %p689_p13 = pnand %p425_p10, %p654_p5  ;;  %s693_s10 = int_to_ptr.vmem [resolvable:$true] %s178_s10 }
  0x17   : > { %s168_s12 = scalar_lea.sflag [#allocation3], %s674_s29  ;;  %s461_s13 = scalar_lea.hbm %s683_s8, 128 }
  0x18   : > { %p462_p2 = scmp.ne.s32.totalorder %s683_s8, %s461_s13  ;;  %p463_p3 = pneg %p689_p13 }
  0x19   : > { %s466_s22 = scalar_lea.hbm %s823_s0, 256  ;;  %p467_p5 = scmp.lt.s32.totalorder %s683_s8, %s823_s0 }
  0x1a   : > { %p464_p4 = pnand %p463_p3, %p462_p2  ;;  %p468_p8 = scmp.lt.s32.totalorder %s466_s22, %s461_s13 }
  0x1c   : > { %p465_p7 = pneg %p464_p4  ;;  %p469_p10 = por %p468_p8, %p467_p5 }
  0x1e   : > { %p470_p9 = pnand %p469_p10, %p465_p7 }
  0x20   : > { %473 = shalt.err (!%p470_p9)
}
  0x21   : > { %s474_s6 = scalar_lea.vmem %s693_s10, 128  ;;  %s587_s7 = smov [#allocation2]  }
  0x22   : > { %p475_p0 = scmp.ne.s32.totalorder %s693_s10, %s474_s6  ;;  %s479_s9 = sshll.u32 %s587_s7, 4  ;;  %s480_s9 = int_to_ptr.vmem [resolvable:$false] %s479_s9 }
  0x23   : > { %s481_s14 = scalar_lea.vmem %s480_s9, 256  ;;  %p482_p1 = scmp.lt.s32.totalorder %s693_s10, %s480_s9 }
  0x24   : > { %p477_p2 = pnand %p475_p0, %p463_p3  ;;  %p483_p12 = scmp.lt.s32.totalorder %s481_s14, %s474_s6 }
  0x26   : > { %p478_p4 = pneg %p477_p2  ;;  %p484_p11 = por %p483_p12, %p482_p1 }
  0x28   : > { %p485_p5 = pnand %p484_p11, %p478_p4 }
  0x2a   : > { %488 = shalt.err (!%p485_p5)
}
  0x2b   : > { %417 = dma.hbm_to_vmem [thread:$0]  (!%p689_p13), %s683_s8, 128, %s693_s10, %s168_s12  }
  0x2c   : > { %p835_p9 = scmp.lt.s32.totalorder %s585_s18, 3  ;;  %p836_p0 = scmp.ge.s32.totalorder %s585_s18, 1 }
  0x2d   : > { %s735_s23 = scalar_lea.hbm %s824_s1, %s395_s30  ;;  %s189_s25 = scalar_lea.vmem [#allocation5], %s394_s5 }
  0x2e   : > { %p726_p7 = pnand %p836_p0, %p835_p9  ;;  %s196_s6 = sshll.u32 %s189_s25, 4  ;;  %s197_s6 = int_to_ptr.vmem [resolvable:$true] %s196_s6 }
  0x2f   : > { %s186_s8 = scalar_lea.sflag [#allocation6], %s674_s29  ;;  %s489_s10 = scalar_lea.hbm %s735_s23, 128 }
  0x30   : > { %s837_s13 = scalar_select %p726_p7, 1, 0 }
  0x31   : > { %p490_p11 = scmp.ne.s32.totalorder %s735_s23, %s489_s10  ;;  %s494_s9 = scalar_lea.hbm %s824_s1, 256 }
  0x32   : > { %p495_p8 = scmp.lt.s32.totalorder %s735_s23, %s824_s1  ;;  %p496_p10 = scmp.lt.s32.totalorder %s494_s9, %s489_s10 }
  0x33   : > { %p492_p12 = pnand %p490_p11, %p463_p3 }
  0x34   : > { %p497_p2 = por %p496_p10, %p495_p8 }
  0x35   : > { %p493_p1 = pneg %p492_p12 }
  0x37   : > { %p498_p4 = pnand %p497_p2, %p493_p1 }
  0x39   : > { %501 = shalt.err (!%p498_p4)
}
  0x3a   : > { %s502_s5 = scalar_lea.vmem %s197_s6, 128  ;;  %s588_s29 = smov [#allocation5]  }
  0x3b   : > { %p503_p5 = scmp.ne.s32.totalorder %s197_s6, %s502_s5  ;;  %s507_s20 = sshll.u32 %s588_s29, 4  ;;  %s508_s20 = int_to_ptr.vmem [resolvable:$false] %s507_s20 }
  0x3c   : > { %s509_s22 = scalar_lea.vmem %s508_s20, 256  ;;  %p510_p11 = scmp.lt.s32.totalorder %s197_s6, %s508_s20 }
  0x3d   : > { %p505_p9 = pnand %p503_p5, %p463_p3  ;;  %p511_p12 = scmp.lt.s32.totalorder %s509_s22, %s502_s5 }
  0x3f   : > { %p506_p0 = pneg %p505_p9  ;;  %p512_p6 = por %p511_p12, %p510_p11 }
  0x41   : > { %p513_p7 = pnand %p512_p6, %p506_p0 }
  0x43   : > { %516 = shalt.err (!%p513_p7)
}
  0x44   : > { %420 = dma.hbm_to_vmem [thread:$0]  (!%p689_p13), %s735_s23, 128, %s197_s6, %s186_s8  }
  0x45   : > { %p838_p1 = scmp.ne.s32.totalorder %s837_s13, 0 }
  0x46   : > { %s761_s25 = sand.u32 (!%p838_p1), 1, %s577_s16   ;;  %p839_p6 = scmp.ne.s32.totalorder (!%p838_p1), %s831_s26, 0 }
  0x47   : > { %205 = sbr.rel (%p838_p1) target bundleno = 403 (0x193), region = 36  ;;  %s764_s10 = sshll.u32 (!%p838_p1), %s761_s25, 3 }
  0x48   : > { %s208_s12 = scalar_lea.sflag (!%p838_p1), [#allocation3], %s761_s25  ;;  %s211_s7 = scalar_lea.vmem (!%p838_p1), [#allocation2], %s764_s10 }
  0x4c   : > { %560 = dma.done.wait (%p839_p6), %s208_s12, 128  }
  0x4d   : > { %562 = vsyncadd (%p839_p6), %s208_s12, 4294967168  ;;  %s217_s11 = scalar_lea.sflag [#allocation6], %s761_s25  ;;  %s220_s13 = scalar_lea.vmem [#allocation5], %s764_s10 }
  0x4e   : > { %564 = dma.done.wait (%p839_p6), %s217_s11, 128  }
  0x4f   : > { %566 = vsyncadd (%p839_p6), %s217_s11, 4294967168  ;;  %vm253_vm0 = vcmask 261120   ;;  %v250_v0 = vld [vmem:[%s211_s7] sm:$0xff]  ;;  %v281_v15 = vld [vmem:[%s220_s13] sm:$0xff]  ;;  %s405_s9 = sshll.u32 %s636_s19, 7  ;;  %s249_s30 = scalar_lea.vmem [#allocation7], %s764_s10 }
  0x50   : > { %v254_v1 = vsel %vm253_vm0, %v250_v0, 0.0  ;;  %v402_v11 = vld [vmem:[%s825_s2] ss:$0 sm:$0xff]  ;;  %s298_s14 = sshll.u32 %s249_s30, 4  ;;  %s296_s20 = scalar_lea.hbm %s827_s4, %s405_s9  ;;  %s299_s14 = int_to_ptr.vmem [resolvable:$true] %s298_s14 }
  0x51   : > { %255 = vadd.xlane.f32.xlu0 %v254_v1  ;;  %v403_v13 = vld [vmem:[%s826_s3] ss:$0 sm:$0xff]  ;;  %s285_s22 = scalar_lea.sflag [#allocation4], %s761_s25  ;;  %s517_s12 = scalar_lea.vmem %s299_s14, 128 }
  0x52   : > { %p518_p13 = scmp.ne.s32.totalorder %s299_s14, %s517_s12  ;;  %p840_p3 = scmp.ne.s32.totalorder %s832_s27, 0 }
  0x53   : > { %s589_s7 = smov [#allocation7]  }
  0x54   : > { %p519_p7 = pnand %p518_p13, %p840_p3  ;;  %s521_s11 = sshll.u32 %s589_s7, 4  ;;  %s522_s11 = int_to_ptr.vmem [resolvable:$false] %s521_s11 }
  0x55   : > { %s523_s19 = scalar_lea.vmem %s522_s11, 256  ;;  %p524_p10 = scmp.lt.s32.totalorder %s299_s14, %s522_s11 }
  0x56   : > { %p520_p8 = pneg %p519_p7  ;;  %p525_p2 = scmp.lt.s32.totalorder %s523_s19, %s517_s12 }
  0x58   : > { %p526_p4 = por %p525_p2, %p524_p10 }
  0x5a   : > { %p527_p5 = pnand %p526_p4, %p520_p8 }
  0xda   : > { %v256_v2 = vpop.xlane.xlu0 %255 }
  0xdb   : > { %v257_v3 = vmul.f32 0.03125, %v256_v2 }
  0xdd   : > { %v258_v4 = vsub.f32 %v250_v0, %v257_v3 }
  0xdf   : > { %v259_v5 = vmul.f32 %v258_v4, %v258_v4 }
  0xe1   : > { %v260_v6 = vsel %vm253_vm0, %v259_v5, 0.0 }
  0xe2   : > { %261 = vadd.xlane.f32.xlu0 %v260_v6 }
 0x16b   : > { %v262_v7 = vpop.xlane.xlu0 %261 }
 0x16c   : > { %v263_v8 = vmul.f32 0.03125, %v262_v7 }
 0x16e   : > { %v264_v9 = vadd.f32 1e-05, %v263_v8 }
 0x170   : > { %459 = vrsqrt.f32 %v264_v9 }
 0x17d   : > { %v460_v10 = vpop.eup %459 }
 0x17e   : > { %v266_v12 = vmul.f32 %v460_v10, %v258_v4 }
 0x180   : > { %v273_v14 = vmul.f32 %v402_v11, %v266_v12 }
 0x182   : > { %v280_v16 = vadd.f32 %v403_v13, %v273_v14 }
 0x184   : > { %v282_v17 = vadd.f32 %v281_v15, %v280_v16 }
 0x186   : > { %283 = vst.msk [vmem:[%s249_s30] sm:$0xff] %vm253_vm0, %v282_v17 }
 0x187   : > { %530 = shalt.err (!%p527_p5)
}
 0x188   : > { %s531_s10 = scalar_lea.hbm %s296_s20, 128  ;;  %s535_s26 = scalar_lea.hbm %s827_s4, 256 }
 0x189   : > { %p532_p9 = scmp.ne.s32.totalorder %s296_s20, %s531_s10  ;;  %p536_p12 = scmp.lt.s32.totalorder %s296_s20, %s827_s4 }
 0x18a   : > { %p537_p1 = scmp.lt.s32.totalorder %s535_s26, %s531_s10 }
 0x18b   : > { %p533_p0 = pnand %p532_p9, %p840_p3 }
 0x18c   : > { %p538_p6 = por %p537_p1, %p536_p12 }
 0x18d   : > { %p534_p11 = pneg %p533_p0 }
 0x18f   : > { %p539_p13 = pnand %p538_p6, %p534_p11 }
 0x191   : > { %542 = shalt.err (!%p539_p13)
}
 0x192   : > { %412 = dma.vmem_to_hbm [thread:$0]  (%p840_p3), %s299_s14, 128, %s296_s20, %s285_s22  }
 0x193 PF: > { %s310_s8 = sand.u32 1, %s573_s15   ;;  %p841_p7 = scmp.ne.s32.totalorder %s833_s28, 0 }
 0x194   : > { %p842_p8 = scmp.ge.s32.totalorder %s585_s18, 2  ;;  %s311_s9 = scalar_lea.sflag [#allocation4], %s310_s8 }
 0x196   : > { %p422_p10 = pnand %p842_p8, %p841_p7 }
 0x198   : > { %p423_p2 = pneg %p422_p10 }
 0x19a   : > { %568 = dma.done.wait (%p423_p2), %s311_s9, 128  }
 0x19b   : > { %570 = vsyncadd (%p423_p2), %s311_s9, 4294967168  ;;  %p20_p4 = scmp.ge.s32.totalorder %s640_s21, 4   ;;  %s843_s15 = smov %s577_s16 }
 0x19c   : > { %s844_s16 = smov %s581_s17  ;;  %s845_s17 = smov %s652_s24 }
 0x19d   : > { %s846_s18 = smov %s640_s21  ;;  %22 = sbr.rel (!%p20_p4) target bundleno = 7 (0x7), region = 94 }
 0x1a2   :  { %316 = vsyncpa [#allocation3], 1 }
 0x1a3   :  { %318 = vsyncpa [#allocation3 + $0x1], 1 }
 0x1a4   :  { %319 = vsyncpa [#allocation6], 1 }
 0x1a5   :  { %321 = vsyncpa [#allocation6 + $0x1], 1 }
 0x1a6   :  { %322 = vsyncpa [#allocation4], 1 }
 0x1a7   :  { %324 = vsyncpa [#allocation4 + $0x1], 1 }

</bundles_post_ra>
